<compile_context>
chip_gen: v6e
topology: v6e:2x2x1
jax: 0.10.0
libtpu: 0.0.40
codegen_flags: <defaults>
</compile_context>

<pallas_src>
import functools

import jax
import jax.numpy as jnp
from jax import lax
from jax.experimental import pallas as pl
from jax.experimental.pallas import tpu as pltpu


def _round_up(a, m):
    return (a + m - 1) // m * m


def value_net_kernel(batch_ref, x_ref, bn_gamma_ref, bn_beta_ref,
                     lins_w_ref, lins_b_ref, lin1_w_ref, lin1_b_ref,
                     out_ref, sum_ref, cnt_ref, *,
                     num_graphs, hidden, n_lin_value, mask_tail, tail_rows,
                     eps=1e-5):
    step = pl.program_id(0)
    last = pl.num_programs(0) - 1
    tile_n = x_ref.shape[0]
    b_pad = sum_ref.shape[0]

    @pl.when(step == 0)
    def _init():
        sum_ref[...] = jnp.zeros_like(sum_ref)
        cnt_ref[...] = jnp.zeros_like(cnt_ref)

    # --- per-tile segment pooling --------------------------------------------
    b_ids = batch_ref[...]                                     # [1, TILE_N] int32
    graph_iota = lax.broadcasted_iota(jnp.int32, (b_pad, tile_n), 0)
    seg = (b_ids == graph_iota).astype(jnp.float32)            # one-hot (exact 0/1)

    # Counts: lane-reduce of seg (independent of x; padded ids are -1 -> all-zero cols).
    cnt_ref[...] += jnp.sum(seg, axis=1, keepdims=True)

    def accumulate(x_tile):
        # Segment sums: one-hot(batch) @ x on the MXU, f32 accumulation.
        sum_ref[...] += jnp.dot(seg, x_tile, preferred_element_type=jnp.float32)

    if mask_tail:
        # x is not padded in HBM: only the (single, statically known) ragged tail
        # tile masks its out-of-bounds rows; all full tiles skip the select.
        @pl.when(step != last)
        def _full_tiles():
            accumulate(x_ref[...])

        @pl.when(step == last)
        def _tail_tile():
            row_iota = lax.broadcasted_iota(jnp.int32, x_ref.shape, 0)
            accumulate(jnp.where(row_iota < tail_rows, x_ref[...], 0.0))
    else:
        accumulate(x_ref[...])

    # --- epilogue on the last node tile: BN + tanh-MLP + value head ------------
    @pl.when(step == last)
    def _finish():
        x1 = sum_ref[...]                                      # [B_pad, H]  add pool
        counts = cnt_ref[...]                                  # [B_pad, 1]  nodes / graph
        x2 = x1 / jnp.maximum(counts, 1.0)                     # mean pool
        h = jnp.concatenate([x1, x2], axis=1)                  # [B_pad, 2H]

        # BatchNorm1d, training-mode biased batch stats over the real graphs only.
        d2 = 2 * hidden
        row_mask = (lax.broadcasted_iota(jnp.int32, (b_pad, d2), 0)
                    < num_graphs).astype(jnp.float32)
        inv_b = 1.0 / float(num_graphs)
        mean = jnp.sum(h * row_mask, axis=0, keepdims=True) * inv_b
        diff = (h - mean) * row_mask
        var = jnp.sum(diff * diff, axis=0, keepdims=True) * inv_b
        h = (h - mean) * lax.rsqrt(var + eps)
        h = h * bn_gamma_ref[...] + bn_beta_ref[...]

        # Hidden Linear(2H, 2H) + tanh stack (static trip count, f32 on the MXU).
        for l in range(n_lin_value):
            h = jnp.tanh(jnp.dot(h, lins_w_ref[l],
                                 preferred_element_type=jnp.float32)
                         + lins_b_ref[l])

        # Final Linear(2H, 1): VPU multiply + lane reduce (weight is [1, 2H]).
        out = jnp.sum(h * lin1_w_ref[...], axis=1, keepdims=True) + lin1_b_ref[...]
        out_ref[...] = out.astype(out_ref.dtype)


def value_net_forward(x, edge_index_connections, edge_index_destinations,
                      batch, params, num_graphs, *, tile_n=None):
    """Pallas wrapper. edge_index_* are unused by the forward pass."""
    del edge_index_connections, edge_index_destinations
    n_nodes, hidden = x.shape
    d = 2 * hidden
    n_lin_value = params["lins_w"].shape[0]
    b_pad = _round_up(max(num_graphs, 1), 8)

    lane, sub = 128, 8
    hidden_pad = _round_up(hidden, lane)
    d_pad = _round_up(d, lane)
    x_itemsize = jnp.dtype(x.dtype).itemsize

    # --- per-generation VMEM budget & default tile ----------------------------
    try:
        vmem_cap = int(getattr(pltpu.get_tpu_info(), "vmem_capacity_bytes"))
    except Exception:
        vmem_cap = 64 << 20          # assume the smallest-VMEM generation (v7x)
    big_vmem = vmem_cap >= (100 << 20)          # v5e / v6e: 128 MiB physical
    budget = (96 << 20) if big_vmem else (44 << 20)
    default_tn = 32768 if big_vmem else 16384

    # --- lane-padding-aware VMEM accounting (bytes) ----------------------------
    #   x block   : (tn, H) lane-pads to (tn, 128)      -> tn*hidden_pad*isz / buffer
    #   batch blk : (1, tn) i32 sublane-pads to (8, tn) -> 8*tn*4 / buffer
    #   seg temp  : (b_pad, tn) f32 one-hot             -> b_pad*tn*4
    per_node = 2 * (hidden_pad * x_itemsize + sub * 4) + b_pad * 4
    fixed = (2 * 4 * (n_lin_value * _round_up(d, sub) * d_pad     # lins_w  (x2 buffers)
                      + n_lin_value * sub * d_pad                 # lins_b
                      + 2 * sub * d_pad                           # bn gamma / beta
                      + sub * d_pad + sub * lane                  # lin1_w, lin1_b
                      + _round_up(b_pad, sub) * lane)             # out block
             + 4 * b_pad * (hidden_pad + lane)                    # sum / count accumulators
             + (2 << 20))                                         # epilogue temps + margin
    tn_budget_cap = max(1024, int((budget / 1.25 - fixed) // per_node))

    if tile_n is None:
        tile_n = default_tn
    tn_target = max(128, min(int(tile_n), tn_budget_cap))

    # --- tiling geometry (x is never copied/padded in HBM) ---------------------
    if n_nodes <= tn_target:
        tn = _round_up(max(n_nodes, 1), sub)         # single tile, sublane-aligned
        num_tiles = 1
    else:
        tn = max(lane, (tn_target // lane) * lane)   # lane-aligned tile (batch-id block)
        num_tiles = (n_nodes + tn - 1) // tn
    n_pad = num_tiles * tn
    mask_tail = (n_pad != n_nodes)
    tail_rows = n_nodes - (num_tiles - 1) * tn       # real rows in the last tile

    est = fixed + per_node * tn
    vmem_limit = int(min(budget, max(16 << 20, int(est * 1.25))))

    # Only the tiny batch-id vector gets padded (with -1 -> pooled into nothing).
    if mask_tail:
        batch_p = jnp.full((1, n_pad), -1, jnp.int32).at[0, :n_nodes].set(
            batch.astype(jnp.int32))
    else:
        batch_p = batch.astype(jnp.int32).reshape(1, n_nodes)
    lin1_w_row = jnp.reshape(params["lin1_w"], (1, d))    # lane-major head weight

    kernel = functools.partial(value_net_kernel,
                               num_graphs=num_graphs,
                               hidden=hidden,
                               n_lin_value=n_lin_value,
                               mask_tail=mask_tail,
                               tail_rows=tail_rows)

    # Resident parameters: constant index_map -> DMA'd once, stay in VMEM.
    def resident(*shape):
        return pl.BlockSpec(shape, lambda i, _n=len(shape): (0,) * _n)

    grid_spec = pltpu.PrefetchScalarGridSpec(
        num_scalar_prefetch=0,
        grid=(num_tiles,),
        in_specs=[
            pl.BlockSpec((1, tn), lambda i: (0, i)),           # batch ids (node-tiled)
            pl.BlockSpec((tn, hidden), lambda i: (i, 0)),      # x          (node-tiled)
            resident(1, d),                                    # bn_gamma
            resident(1, d),                                    # bn_beta
            resident(n_lin_value, d, d),                       # lins_w
            resident(n_lin_value, 1, d),                       # lins_b
            resident(1, d),                                    # lin1_w (as [1, 2H])
            resident(1, 1),                                    # lin1_b
        ],
        out_specs=pl.BlockSpec((b_pad, 1), lambda i: (0, 0)),
        scratch_shapes=[pltpu.VMEM((b_pad, hidden), jnp.float32),   # segment sums
                        pltpu.VMEM((b_pad, 1), jnp.float32)],       # segment counts
    )

    out_full = pl.pallas_call(
        kernel,
        out_shape=jax.ShapeDtypeStruct((b_pad, 1), jnp.float32),
        grid_spec=grid_spec,
        compiler_params=pltpu.CompilerParams(
            dimension_semantics=("arbitrary",),   # node axis reduces into scratch
            vmem_limit_bytes=vmem_limit),
    )(batch_p, x, params["bn_gamma"], params["bn_beta"],
      params["lins_w"], params["lins_b"], lin1_w_row, params["lin1_b"])
    return out_full[:num_graphs]


def init_params(key, hidden_neurons, n_lin_value):
    """Deterministic PyTorch-default-style init (uniform +/- 1/sqrt(fan_in))."""
    d = hidden_neurons * 2
    keys = jax.random.split(key, 2 * n_lin_value + 2)
    bound = 1.0 / jnp.sqrt(jnp.float32(d))
    lins_w = jnp.stack([
        jax.random.uniform(keys[i], (d, d), jnp.float32, -bound, bound)
        for i in range(n_lin_value)
    ])                                                       # [L, in, out]
    lins_b = jnp.stack([
        jax.random.uniform(keys[n_lin_value + i], (1, d), jnp.float32, -bound, bound)
        for i in range(n_lin_value)
    ])                                                       # [L, 1, 2H]
    lin1_w = jax.random.uniform(keys[-2], (d, 1), jnp.float32, -bound, bound)
    lin1_b = jax.random.uniform(keys[-1], (1, 1), jnp.float32, -bound, bound)
    return {
        "lins_w": lins_w,
        "lins_b": lins_b,
        "lin1_w": lin1_w,
        "lin1_b": lin1_b,
        "bn_gamma": jnp.ones((1, d), jnp.float32),
        "bn_beta": jnp.zeros((1, d), jnp.float32),
        "c": jnp.array([0.1], jnp.float32),   # unused in forward
    }


def ref_forward(x, batch, params, num_graphs, eps=1e-5):
    """Pure-JAX reference mirroring the PyTorch forward."""
    x1 = jax.ops.segment_sum(x, batch, num_segments=num_graphs)
    counts = jax.ops.segment_sum(jnp.ones((x.shape[0],), jnp.float32),
                                 batch, num_segments=num_graphs)
    x2 = x1 / jnp.maximum(counts, 1.0)[:, None]
    h = jnp.concatenate([x1, x2], axis=1)
    mean = h.mean(axis=0, keepdims=True)
    var = ((h - mean) ** 2).mean(axis=0, keepdims=True)
    h = (h - mean) / jnp.sqrt(var + eps)
    h = h * params["bn_gamma"] + params["bn_beta"]
    for l in range(params["lins_w"].shape[0]):
        h = jnp.tanh(h @ params["lins_w"][l] + params["lins_b"][l])
    return h @ params["lin1_w"] + params["lin1_b"]


if __name__ == "__main__":
    HIDDEN_NEURONS = 16      # -> concatenated feature width 2H = 32
    N_LIN_VALUE = 2          # config.n_lin_value
    NUM_GRAPHS = 4           # padded to 8 graph rows inside the kernel

    key = jax.random.PRNGKey(0)
    k_x, k_p, k_x2 = jax.random.split(key, 3)
    params = init_params(k_p, HIDDEN_NEURONS, N_LIN_VALUE)

    # dummy edge indices (unused by the forward pass)
    edge_index_connections = jnp.zeros((2, 4), jnp.int32)
    edge_index_destinations = jnp.zeros((2, 4), jnp.int32)

    # --- Case A: ragged node count (200 nodes, tile 128 -> 2 tiles, 72-row tail mask)
    x_a = jax.random.normal(k_x, (200, HIDDEN_NEURONS), jnp.float32)
    batch_a = jnp.concatenate([jnp.zeros((60,), jnp.int32),
                               jnp.ones((50,), jnp.int32),
                               jnp.full((40,), 2, jnp.int32),
                               jnp.full((50,), 3, jnp.int32)])
    ref_a = ref_forward(x_a, batch_a, params, NUM_GRAPHS)
    out_a = jax.block_until_ready(value_net_forward(
        x_a, edge_index_connections, edge_index_destinations,
        batch_a, params, NUM_GRAPHS, tile_n=128))
    assert out_a.shape == (NUM_GRAPHS, 1), out_a.shape
    # Tolerance allows for TPU default-precision MXU pooling vs. exact f32 ref sums.
    assert jnp.allclose(out_a, ref_a, atol=2e-2, rtol=2e-2), (out_a, ref_a)

    # --- Case A': same inputs, auto (per-generation) tile -> single-tile path
    out_a1 = jax.block_until_ready(value_net_forward(
        x_a, edge_index_connections, edge_index_destinations,
        batch_a, params, NUM_GRAPHS))
    assert jnp.allclose(out_a1, ref_a, atol=2e-2, rtol=2e-2), (out_a1, ref_a)

    # --- Case B: node count divisible by the tile (no tail mask, no padding at all)
    x_b = jax.random.normal(k_x2, (256, HIDDEN_NEURONS), jnp.float32)
    batch_b = jnp.concatenate([jnp.zeros((80,), jnp.int32),
                               jnp.ones((60,), jnp.int32),
                               jnp.full((70,), 2, jnp.int32),
                               jnp.full((46,), 3, jnp.int32)])
    ref_b = ref_forward(x_b, batch_b, params, NUM_GRAPHS)
    out_b = jax.block_until_ready(value_net_forward(
        x_b, edge_index_connections, edge_index_destinations,
        batch_b, params, NUM_GRAPHS, tile_n=128))
    assert out_b.shape == (NUM_GRAPHS, 1), out_b.shape
    assert jnp.allclose(out_b, ref_b, atol=2e-2, rtol=2e-2), (out_b, ref_b)

    print("KERNEL_OK")
</pallas_src>

<mosaic_0001>
module attributes {stable_mosaic.version = 11 : i64} {
  func.func @value_net_kernel(%arg0: i32, %arg1: memref<1x128xi32, #tpu.memory_space<vmem>>, %arg2: memref<128x16xf32, #tpu.memory_space<vmem>>, %arg3: memref<1x32xf32, #tpu.memory_space<vmem>>, %arg4: memref<1x32xf32, #tpu.memory_space<vmem>>, %arg5: memref<2x32x32xf32, #tpu.memory_space<vmem>>, %arg6: memref<2x1x32xf32, #tpu.memory_space<vmem>>, %arg7: memref<1x32xf32, #tpu.memory_space<vmem>>, %arg8: memref<1x1xf32, #tpu.memory_space<vmem>>, %arg9: memref<8x1xf32, #tpu.memory_space<vmem>>, %arg10: memref<8x16xf32, #tpu.memory_space<vmem>>, %arg11: memref<8x1xf32, #tpu.memory_space<vmem>>) attributes {dimension_semantics = [#tpu.dimension_semantics<arbitrary>], iteration_bounds = array<i64: 2>, scalar_prefetch = 0 : i64, scratch_operands = 2 : i64, tpu.core_type = #tpu.core_type<tc>, window_params = [{transform_indices = @transform_0, window_bounds = array<i64: 1, 128>}, {transform_indices = @transform_1, window_bounds = array<i64: 128, 16>}, {pipeline_mode = #tpu.pipeline_mode<synchronous>, transform_indices = @transform_2, window_bounds = array<i64: 1, 32>}, {pipeline_mode = #tpu.pipeline_mode<synchronous>, transform_indices = @transform_3, window_bounds = array<i64: 1, 32>}, {pipeline_mode = #tpu.pipeline_mode<synchronous>, transform_indices = @transform_4, window_bounds = array<i64: 2, 32, 32>}, {pipeline_mode = #tpu.pipeline_mode<synchronous>, transform_indices = @transform_5, window_bounds = array<i64: 2, 1, 32>}, {pipeline_mode = #tpu.pipeline_mode<synchronous>, transform_indices = @transform_6, window_bounds = array<i64: 1, 32>}, {pipeline_mode = #tpu.pipeline_mode<synchronous>, transform_indices = @transform_7, window_bounds = array<i64: 1, 1>}, {pipeline_mode = #tpu.pipeline_mode<synchronous>, transform_indices = @transform_8, window_bounds = array<i64: 8, 1>}]} {
    %c0_i32 = arith.constant 0 : i32
    %0 = arith.cmpi eq, %arg0, %c0_i32 : i32
    %1 = arith.extui %0 : i1 to i32
    %c0_i32_0 = arith.constant 0 : i32
    %2 = arith.cmpi ne, %1, %c0_i32_0 : i32
    scf.if %2 {
      %cst_11 = arith.constant 0.000000e+00 : f32
      %23 = vector.broadcast %cst_11 : f32 to vector<8x16xf32>
      %c0_12 = arith.constant 0 : index
      %c0_13 = arith.constant 0 : index
      %24 = vector.load %arg10[%c0_12, %c0_13] : memref<8x16xf32, #tpu.memory_space<vmem>>, vector<8x16xf32>
      tpu.vector_store %arg10[%c0_12, %c0_13], %23 {strides = array<i32>} : memref<8x16xf32, #tpu.memory_space<vmem>>, vector<8x16xf32>,
      %cst_14 = arith.constant 0.000000e+00 : f32
      %25 = vector.broadcast %cst_14 : f32 to vector<8x1xf32>
      %c0_15 = arith.constant 0 : index
      %c0_16 = arith.constant 0 : index
      %26 = vector.load %arg11[%c0_15, %c0_16] : memref<8x1xf32, #tpu.memory_space<vmem>>, vector<8x1xf32>
      tpu.vector_store %arg11[%c0_15, %c0_16], %25 {strides = array<i32>} : memref<8x1xf32, #tpu.memory_space<vmem>>, vector<8x1xf32>,
    } else {
    }
    %c0 = arith.constant 0 : index
    %c0_1 = arith.constant 0 : index
    %3 = vector.load %arg1[%c0, %c0_1] : memref<1x128xi32, #tpu.memory_space<vmem>>, vector<1x128xi32>
    %4 = tpu.iota {dimensions = array<i32: 0>} : vector<8x128xi32>
    %5 = vector.broadcast %3 : vector<1x128xi32> to vector<8x128xi32>
    %6 = arith.cmpi eq, %5, %4 : vector<8x128xi32>
    %7 = arith.extui %6 : vector<8x128xi1> to vector<8x128xi32>
    %8 = arith.sitofp %7 : vector<8x128xi32> to vector<8x128xf32>
    %c0_2 = arith.constant 0 : index
    %c0_3 = arith.constant 0 : index
    %9 = vector.load %arg11[%c0_2, %c0_3] : memref<8x1xf32, #tpu.memory_space<vmem>>, vector<8x1xf32>
    %cst = arith.constant dense<0.000000e+00> : vector<8xf32>
    %10 = vector.multi_reduction <add>, %8, %cst [1] : vector<8x128xf32> to vector<8xf32>
    %11 = vector.shape_cast %10 : vector<8xf32> to vector<8x1xf32>
    %12 = arith.addf %9, %11 : vector<8x1xf32>
    %c0_4 = arith.constant 0 : index
    %c0_5 = arith.constant 0 : index
    %13 = vector.load %arg11[%c0_4, %c0_5] : memref<8x1xf32, #tpu.memory_space<vmem>>, vector<8x1xf32>
    tpu.vector_store %arg11[%c0_4, %c0_5], %12 {strides = array<i32>} : memref<8x1xf32, #tpu.memory_space<vmem>>, vector<8x1xf32>,
    %c1_i32 = arith.constant 1 : i32
    %14 = arith.cmpi ne, %arg0, %c1_i32 : i32
    %15 = arith.extui %14 : i1 to i32
    %c0_i32_6 = arith.constant 0 : i32
    %16 = arith.cmpi ne, %15, %c0_i32_6 : i32
    scf.if %16 {
      %c0_11 = arith.constant 0 : index
      %c0_12 = arith.constant 0 : index
      %23 = vector.load %arg2[%c0_11, %c0_12] : memref<128x16xf32, #tpu.memory_space<vmem>>, vector<128x16xf32>
      %c0_13 = arith.constant 0 : index
      %c0_14 = arith.constant 0 : index
      %24 = vector.load %arg10[%c0_13, %c0_14] : memref<8x16xf32, #tpu.memory_space<vmem>>, vector<8x16xf32>
      %cst_15 = arith.constant dense<0.000000e+00> : vector<8x16xf32>
      %25 = tpu.matmul %8, %23, %cst_15 {dimension_numbers = #tpu.dot_dimension_numbers<[1], [0], [0], [1], [0, 0, 1, 1], [], []>} : vector<8x128xf32>, vector<128x16xf32>, vector<8x16xf32> -> vector<8x16xf32>
      %26 = arith.addf %24, %25 : vector<8x16xf32>
      %c0_16 = arith.constant 0 : index
      %c0_17 = arith.constant 0 : index
      %27 = vector.load %arg10[%c0_16, %c0_17] : memref<8x16xf32, #tpu.memory_space<vmem>>, vector<8x16xf32>
      tpu.vector_store %arg10[%c0_16, %c0_17], %26 {strides = array<i32>} : memref<8x16xf32, #tpu.memory_space<vmem>>, vector<8x16xf32>,
    } else {
    }
    %c1_i32_7 = arith.constant 1 : i32
    %17 = arith.cmpi eq, %arg0, %c1_i32_7 : i32
    %18 = arith.extui %17 : i1 to i32
    %c0_i32_8 = arith.constant 0 : i32
    %19 = arith.cmpi ne, %18, %c0_i32_8 : i32
    scf.if %19 {
      %23 = tpu.iota {dimensions = array<i32: 0>} : vector<128x16xi32>
      %c72_i32 = arith.constant 72 : i32
      %24 = vector.broadcast %c72_i32 : i32 to vector<128x16xi32>
      %25 = arith.cmpi slt, %23, %24 : vector<128x16xi32>
      %c0_11 = arith.constant 0 : index
      %c0_12 = arith.constant 0 : index
      %26 = vector.load %arg2[%c0_11, %c0_12] : memref<128x16xf32, #tpu.memory_space<vmem>>, vector<128x16xf32>
      %cst_13 = arith.constant 0.000000e+00 : f32
      %27 = vector.broadcast %cst_13 : f32 to vector<128x16xf32>
      %28 = arith.select %25, %26, %27 : vector<128x16xi1>, vector<128x16xf32>
      %c0_14 = arith.constant 0 : index
      %c0_15 = arith.constant 0 : index
      %29 = vector.load %arg10[%c0_14, %c0_15] : memref<8x16xf32, #tpu.memory_space<vmem>>, vector<8x16xf32>
      %cst_16 = arith.constant dense<0.000000e+00> : vector<8x16xf32>
      %30 = tpu.matmul %8, %28, %cst_16 {dimension_numbers = #tpu.dot_dimension_numbers<[1], [0], [0], [1], [0, 0, 1, 1], [], []>} : vector<8x128xf32>, vector<128x16xf32>, vector<8x16xf32> -> vector<8x16xf32>
      %31 = arith.addf %29, %30 : vector<8x16xf32>
      %c0_17 = arith.constant 0 : index
      %c0_18 = arith.constant 0 : index
      %32 = vector.load %arg10[%c0_17, %c0_18] : memref<8x16xf32, #tpu.memory_space<vmem>>, vector<8x16xf32>
      tpu.vector_store %arg10[%c0_17, %c0_18], %31 {strides = array<i32>} : memref<8x16xf32, #tpu.memory_space<vmem>>, vector<8x16xf32>,
    } else {
    }
    %c1_i32_9 = arith.constant 1 : i32
    %20 = arith.cmpi eq, %arg0, %c1_i32_9 : i32
    %21 = arith.extui %20 : i1 to i32
    %c0_i32_10 = arith.constant 0 : i32
    %22 = arith.cmpi ne, %21, %c0_i32_10 : i32
    scf.if %22 {
      %c0_11 = arith.constant 0 : index
      %c0_12 = arith.constant 0 : index
      %23 = vector.load %arg10[%c0_11, %c0_12] : memref<8x16xf32, #tpu.memory_space<vmem>>, vector<8x16xf32>
      %c0_13 = arith.constant 0 : index
      %c0_14 = arith.constant 0 : index
      %24 = vector.load %arg11[%c0_13, %c0_14] : memref<8x1xf32, #tpu.memory_space<vmem>>, vector<8x1xf32>
      %cst_15 = arith.constant 1.000000e+00 : f32
      %25 = vector.broadcast %cst_15 : f32 to vector<8x1xf32>
      %26 = arith.maximumf %24, %25 : vector<8x1xf32>
      %27 = vector.broadcast %26 : vector<8x1xf32> to vector<8x16xf32>
      %28 = arith.divf %23, %27 : vector<8x16xf32>
      %29 = tpu.concatenate %23, %28 in 1 : vector<8x16xf32>, vector<8x16xf32> -> vector<8x32xf32>
      %30 = tpu.iota {dimensions = array<i32: 0>} : vector<8x32xi32>
      %c4_i32 = arith.constant 4 : i32
      %31 = vector.broadcast %c4_i32 : i32 to vector<8x32xi32>
      %32 = arith.cmpi slt, %30, %31 : vector<8x32xi32>
      %33 = arith.extui %32 : vector<8x32xi1> to vector<8x32xi32>
      %34 = arith.sitofp %33 : vector<8x32xi32> to vector<8x32xf32>
      %35 = arith.mulf %29, %34 : vector<8x32xf32>
      %cst_16 = arith.constant dense<0.000000e+00> : vector<32xf32>
      %36 = vector.multi_reduction <add>, %35, %cst_16 [0] : vector<8x32xf32> to vector<32xf32>
      %37 = vector.shape_cast %36 : vector<32xf32> to vector<1x32xf32>
      %cst_17 = arith.constant 2.500000e-01 : f32
      %38 = vector.broadcast %cst_17 : f32 to vector<1x32xf32>
      %39 = arith.mulf %37, %38 : vector<1x32xf32>
      %40 = vector.broadcast %39 : vector<1x32xf32> to vector<8x32xf32>
      %41 = arith.subf %29, %40 : vector<8x32xf32>
      %42 = arith.mulf %41, %34 : vector<8x32xf32>
      %43 = arith.mulf %42, %42 : vector<8x32xf32>
      %cst_18 = arith.constant dense<0.000000e+00> : vector<32xf32>
      %44 = vector.multi_reduction <add>, %43, %cst_18 [0] : vector<8x32xf32> to vector<32xf32>
      %45 = vector.shape_cast %44 : vector<32xf32> to vector<1x32xf32>
      %cst_19 = arith.constant 2.500000e-01 : f32
      %46 = vector.broadcast %cst_19 : f32 to vector<1x32xf32>
      %47 = arith.mulf %45, %46 : vector<1x32xf32>
      %48 = vector.broadcast %39 : vector<1x32xf32> to vector<8x32xf32>
      %49 = arith.subf %29, %48 : vector<8x32xf32>
      %cst_20 = arith.constant 9.99999974E-6 : f32
      %50 = vector.broadcast %cst_20 : f32 to vector<1x32xf32>
      %51 = arith.addf %47, %50 : vector<1x32xf32>
      %52 = math.rsqrt %51 : vector<1x32xf32>
      %53 = vector.broadcast %52 : vector<1x32xf32> to vector<8x32xf32>
      %54 = arith.mulf %49, %53 : vector<8x32xf32>
      %c0_21 = arith.constant 0 : index
      %c0_22 = arith.constant 0 : index
      %55 = vector.load %arg3[%c0_21, %c0_22] : memref<1x32xf32, #tpu.memory_space<vmem>>, vector<1x32xf32>
      %56 = vector.broadcast %55 : vector<1x32xf32> to vector<8x32xf32>
      %57 = arith.mulf %54, %56 : vector<8x32xf32>
      %c0_23 = arith.constant 0 : index
      %c0_24 = arith.constant 0 : index
      %58 = vector.load %arg4[%c0_23, %c0_24] : memref<1x32xf32, #tpu.memory_space<vmem>>, vector<1x32xf32>
      %59 = vector.broadcast %58 : vector<1x32xf32> to vector<8x32xf32>
      %60 = arith.addf %57, %59 : vector<8x32xf32>
      %c0_25 = arith.constant 0 : index
      %c0_26 = arith.constant 0 : index
      %c0_27 = arith.constant 0 : index
      %61 = vector.load %arg5[%c0_25, %c0_26, %c0_27] : memref<2x32x32xf32, #tpu.memory_space<vmem>>, vector<1x32x32xf32>
      %62 = vector.shape_cast %61 : vector<1x32x32xf32> to vector<32x32xf32>
      %cst_28 = arith.constant dense<0.000000e+00> : vector<8x32xf32>
      %63 = tpu.matmul %60, %62, %cst_28 {dimension_numbers = #tpu.dot_dimension_numbers<[1], [0], [0], [1], [0, 0, 1, 1], [], []>} : vector<8x32xf32>, vector<32x32xf32>, vector<8x32xf32> -> vector<8x32xf32>
      %c0_29 = arith.constant 0 : index
      %c0_30 = arith.constant 0 : index
      %c0_31 = arith.constant 0 : index
      %64 = vector.load %arg6[%c0_29, %c0_30, %c0_31] : memref<2x1x32xf32, #tpu.memory_space<vmem>>, vector<1x1x32xf32>
      %65 = vector.shape_cast %64 : vector<1x1x32xf32> to vector<1x32xf32>
      %66 = vector.broadcast %65 : vector<1x32xf32> to vector<8x32xf32>
      %67 = arith.addf %63, %66 : vector<8x32xf32>
      %68 = math.tanh %67 : vector<8x32xf32>
      %c1 = arith.constant 1 : index
      %c0_32 = arith.constant 0 : index
      %c0_33 = arith.constant 0 : index
      %69 = vector.load %arg5[%c1, %c0_32, %c0_33] : memref<2x32x32xf32, #tpu.memory_space<vmem>>, vector<1x32x32xf32>
      %70 = vector.shape_cast %69 : vector<1x32x32xf32> to vector<32x32xf32>
      %cst_34 = arith.constant dense<0.000000e+00> : vector<8x32xf32>
      %71 = tpu.matmul %68, %70, %cst_34 {dimension_numbers = #tpu.dot_dimension_numbers<[1], [0], [0], [1], [0, 0, 1, 1], [], []>} : vector<8x32xf32>, vector<32x32xf32>, vector<8x32xf32> -> vector<8x32xf32>
      %c1_35 = arith.constant 1 : index
      %c0_36 = arith.constant 0 : index
      %c0_37 = arith.constant 0 : index
      %72 = vector.load %arg6[%c1_35, %c0_36, %c0_37] : memref<2x1x32xf32, #tpu.memory_space<vmem>>, vector<1x1x32xf32>
      %73 = vector.shape_cast %72 : vector<1x1x32xf32> to vector<1x32xf32>
      %74 = vector.broadcast %73 : vector<1x32xf32> to vector<8x32xf32>
      %75 = arith.addf %71, %74 : vector<8x32xf32>
      %76 = math.tanh %75 : vector<8x32xf32>
      %c0_38 = arith.constant 0 : index
      %c0_39 = arith.constant 0 : index
      %77 = vector.load %arg7[%c0_38, %c0_39] : memref<1x32xf32, #tpu.memory_space<vmem>>, vector<1x32xf32>
      %78 = vector.broadcast %77 : vector<1x32xf32> to vector<8x32xf32>
      %79 = arith.mulf %76, %78 : vector<8x32xf32>
      %cst_40 = arith.constant dense<0.000000e+00> : vector<8xf32>
      %80 = vector.multi_reduction <add>, %79, %cst_40 [1] : vector<8x32xf32> to vector<8xf32>
      %81 = vector.shape_cast %80 : vector<8xf32> to vector<8x1xf32>
      %c0_41 = arith.constant 0 : index
      %c0_42 = arith.constant 0 : index
      %82 = vector.load %arg8[%c0_41, %c0_42] : memref<1x1xf32, #tpu.memory_space<vmem>>, vector<1x1xf32>
      %83 = vector.broadcast %82 : vector<1x1xf32> to vector<8x1xf32>
      %84 = arith.addf %81, %83 : vector<8x1xf32>
      %c0_43 = arith.constant 0 : index
      %c0_44 = arith.constant 0 : index
      %85 = vector.load %arg9[%c0_43, %c0_44] : memref<8x1xf32, #tpu.memory_space<vmem>>, vector<8x1xf32>
      tpu.vector_store %arg9[%c0_43, %c0_44], %84 {strides = array<i32>} : memref<8x1xf32, #tpu.memory_space<vmem>>, vector<8x1xf32>,
    } else {
    }
    return
  }
  func.func @transform_0(%arg0: i32) -> (i32, i32) {
    %c0_i32 = arith.constant 0 : i32
    %c0_i32_0 = arith.constant 0 : i32
    return %c0_i32, %arg0 : i32, i32
  }
  func.func @transform_1(%arg0: i32) -> (i32, i32) {
    %c0_i32 = arith.constant 0 : i32
    %c0_i32_0 = arith.constant 0 : i32
    return %arg0, %c0_i32 : i32, i32
  }
  func.func @transform_2(%arg0: i32) -> (i32, i32) {
    %c0_i32 = arith.constant 0 : i32
    %c0_i32_0 = arith.constant 0 : i32
    %c0_i32_1 = arith.constant 0 : i32
    return %c0_i32, %c0_i32_0 : i32, i32
  }
  func.func @transform_3(%arg0: i32) -> (i32, i32) {
    %c0_i32 = arith.constant 0 : i32
    %c0_i32_0 = arith.constant 0 : i32
    %c0_i32_1 = arith.constant 0 : i32
    return %c0_i32, %c0_i32_0 : i32, i32
  }
  func.func @transform_4(%arg0: i32) -> (i32, i32, i32) {
    %c0_i32 = arith.constant 0 : i32
    %c0_i32_0 = arith.constant 0 : i32
    %c0_i32_1 = arith.constant 0 : i32
    %c0_i32_2 = arith.constant 0 : i32
    return %c0_i32, %c0_i32_0, %c0_i32_1 : i32, i32, i32
  }
  func.func @transform_5(%arg0: i32) -> (i32, i32, i32) {
    %c0_i32 = arith.constant 0 : i32
    %c0_i32_0 = arith.constant 0 : i32
    %c0_i32_1 = arith.constant 0 : i32
    %c0_i32_2 = arith.constant 0 : i32
    return %c0_i32, %c0_i32_0, %c0_i32_1 : i32, i32, i32
  }
  func.func @transform_6(%arg0: i32) -> (i32, i32) {
    %c0_i32 = arith.constant 0 : i32
    %c0_i32_0 = arith.constant 0 : i32
    %c0_i32_1 = arith.constant 0 : i32
    return %c0_i32, %c0_i32_0 : i32, i32
  }
  func.func @transform_7(%arg0: i32) -> (i32, i32) {
    %c0_i32 = arith.constant 0 : i32
    %c0_i32_0 = arith.constant 0 : i32
    %c0_i32_1 = arith.constant 0 : i32
    return %c0_i32, %c0_i32_0 : i32, i32
  }
  func.func @transform_8(%arg0: i32) -> (i32, i32) {
    %c0_i32 = arith.constant 0 : i32
    %c0_i32_0 = arith.constant 0 : i32
    %c0_i32_1 = arith.constant 0 : i32
    return %c0_i32, %c0_i32_0 : i32, i32
  }
}

</mosaic_0001>

<bundles_post_ra>
// kernel: tpu_custom_call.1
= control target key start
LH: loop header
LB: loop body
LE: loop exit
PB: predicated region body
PF: predicated region fallthrough
CT: control target
= control target key end

     0   :  { %s1112_s29 = smov 0   ;;  %s1255_s0 = inlined_call_operand.vmem [shape: s32[1,256], index: 0, kind: input, shape index: {}]   ;;  %s1256_s1 = inlined_call_operand.vmem [shape: f32[200,16], index: 1, kind: input, shape index: {}]   ;;  %s1257_s2 = inlined_call_operand.vmem [shape: f32[1,32], index: 2, kind: input, shape index: {}]   ;;  %s1258_s3 = inlined_call_operand.vmem [shape: f32[1,32], index: 3, kind: input, shape index: {}]   ;;  %s1259_s4 = inlined_call_operand.vmem [shape: f32[2,32,32], index: 4, kind: input, shape index: {}]   ;;  %s1260_s5 = inlined_call_operand.vmem [shape: f32[2,1,32], index: 5, kind: input, shape index: {}]   ;;  %s1261_s6 = inlined_call_operand.vmem [shape: f32[1,32], index: 6, kind: input, shape index: {}]   ;;  %s1262_s7 = inlined_call_operand.<no memory space> [shape: f32[1,1], index: 7, kind: input, shape index: {}]   ;;  %s1263_s8 = inlined_call_operand.vmem [shape: f32[8,1], index: 8, kind: output, shape index: {}]  }
   0x1   :  { %v13_v0 = vstv %s1262_s7 }
   0x2   :  { %14 = vst [vmem:[#allocation4] sm:$0x1] %v13_v0 }
   0x3 LB: > { %s1118_s30 = sadd.s32 4294967295, %s1052_s29   ;;  %p878_p0 = scmp.ge.s32.totalorder %s1052_s29, 1  ;;  %s1052_s29 = sphi %s1112_s29, %s20_s29  }
   0x4   : > { %p276_p1 = scmp.lt.s32.totalorder %s1052_s29, 3 }
   0x6   : > { %p277_p2 = pnand %p878_p0, %p276_p1 }
   0x7   : > { %p312_p3 = scmp.lt.s32.totalorder (!%p277_p2), %s1118_s30, 1  ;;  %s879_s7 = sshll.u32 (!%p277_p2), %s1118_s30, 4 }
   0x8   : > { %280 = sbr.rel (%p277_p2) target bundleno = 1367 (0x557), region = 52  ;;  %p320_p4 = scmp.lt.s32.totalorder (!%p277_p2), %s879_s7, 24 }
   0x9   : > { %p881_p5 = scmp.ne.s32.totalorder (!%p277_p2), %s1118_s30, 0 }
   0xd   : > { %s313_s9 = scalar_select %p312_p3, %s1118_s30, 1 }
   0xe   : > { %s1265_s7 = smov (!%p320_p4, %s879_s7), 24  ;;  %332 = sbr.rel (%p881_p5) target bundleno = 22 (0x16), region = 56 }
   0xf   : > { %s314_s12 = scalar_lea.vmem %s1255_s0, %s313_s9  ;;  %s880_s13 = sshll.u32 %s1265_s7, 3 }
  0x10   : > { %s1131_s16 = scalar_lea.vmem %s1256_s1, %s880_s13 }
  0x13   : > { %vm333_vm0 = vcmask 130048   ;;  %vm335_vm1 = vcmask 7168   ;;  %v1054_v1 = vmov 0.0  }
  0x14   : > { %334 = vst.msk [vmem:[#allocation2] sm:$0xff] %vm333_vm0, %v1054_v1 }
  0x15   : > { %336 = vst.msk [vmem:[#allocation3] sm:$0xff] %vm335_vm1, %v1054_v1 }
  0x16 PF: > { %v338_v2 = vlaneseq  ;;  %v1134_v3 = vld [vmem:[%s314_s12] ss:$0 sm:$0xff]  ;;  %v1055_v5 = vmov 0.0   ;;  %vm351_vm3 = vcmask 7168   ;;  %p884_p6 = scmp.eq.s32.totalorder %s1118_s30, 1 }
  0x18   : > { %v1136_v4 = vshrl.u32 %v338_v2, 7 }
  0x1a   : > { %vm344_vm2 = vcmp.eq.s32.totalorder %v1134_v3, %v1136_v4 }
  0x1b   : > { %v883_v6 = vsel %vm344_vm2, 1.0, %v1055_v5 }
  0x1c   : > { %348 = vadd.xlane.f32.xlu0 %v883_v6  ;;  %v347_v7 = vld [vmem:[#allocation3] sm:$0xff] }
  0xa4   : > { %356 = sbr.rel (%p884_p6) target bundleno = 398 (0x18e), region = 60 }
  0xa5   : > { %v349_v8 = vpop.xlane.xlu0 %348 }
  0xa6   : > { %v350_v9 = vadd.f32 %v349_v8, %v347_v7 }
  0xa8   : > { %352 = vst.msk [vmem:[#allocation3] sm:$0xff] %vm351_vm3, %v350_v9 }
  0xa9   : > { %v372_v10 = vld [vmem:[%s1131_s16 + $0x78] sm:$0xff]  ;;  %v1056_v11 = vmov 0.0   ;;  %v371_v12 = vld [vmem:[%s1131_s16 + $0x70] sm:$0xff]  ;;  %vm1057_vm4 = vmmov 0   ;;  %v370_v13 = vld [vmem:[%s1131_s16 + $0x68] sm:$0xff]  ;;  %v1058_v27 = vmov 1.0  }
  0xaa   : > { %941 = vmatprep.subr.mxu0 %v1056_v11  ;;  %973 = vmatprep.mubr.msk.f32.mxu0 %vm1057_vm4, %v1056_v11  ;;  %v369_v14 = vld [vmem:[%s1131_s16 + $0x60] sm:$0xff]  ;;  %v368_v15 = vld [vmem:[%s1131_s16 + $0x58] sm:$0xff]  ;;  %v367_v16 = vld [vmem:[%s1131_s16 + $0x50] sm:$0xff]  ;;  %vm445_vm5 = vcmask 130048  }
  0xab   : > { %942 = vmatpush3.msra.mxu0 %v372_v10  ;;  %v366_v17 = vld [vmem:[%s1131_s16 + $0x48] sm:$0xff]  ;;  %v365_v18 = vld [vmem:[%s1131_s16 + $0x40] sm:$0xff]  ;;  %v364_v19 = vld [vmem:[%s1131_s16 + $0x38] sm:$0xff] }
  0xac   : > { %943 = vmatprep.subr.mxu0 %v1056_v11  ;;  %v363_v20 = vld [vmem:[%s1131_s16 + $0x30] sm:$0xff]  ;;  %v362_v21 = vld [vmem:[%s1131_s16 + $0x28] sm:$0xff]  ;;  %v361_v22 = vld [vmem:[%s1131_s16 + $0x20] sm:$0xff] }
  0xad   : > { %944 = vmatpush3.msra.mxu0 %v371_v12  ;;  %v360_v23 = vld [vmem:[%s1131_s16 + $0x18] sm:$0xff]  ;;  %v359_v24 = vld [vmem:[%s1131_s16 + $0x10] sm:$0xff]  ;;  %v358_v25 = vld [vmem:[%s1131_s16 + $0x8] sm:$0xff] }
  0xae   : > { %945 = vmatprep.subr.mxu0 %v1056_v11  ;;  %v357_v26 = vld [vmem:[%s1131_s16] sm:$0xff] }
  0xaf   : > { %946 = vmatpush3.msra.mxu0 %v370_v13  ;;  %v373_v28 = vld [vmem:[#allocation2] sm:$0xff] }
  0xb0   : > { %947 = vmatprep.subr.mxu0 %v1056_v11 }
  0xb1   : > { %948 = vmatpush3.msra.mxu0 %v369_v14 }
  0xb2   : > { %949 = vmatprep.subr.mxu0 %v1056_v11 }
  0xb3   : > { %950 = vmatpush3.msra.mxu0 %v368_v15 }
  0xb4   : > { %951 = vmatprep.subr.mxu0 %v1056_v11 }
  0xb5   : > { %952 = vmatpush3.msra.mxu0 %v367_v16 }
  0xb6   : > { %953 = vmatprep.subr.mxu0 %v1056_v11 }
  0xb7   : > { %954 = vmatpush3.msra.mxu0 %v366_v17 }
  0xb8   : > { %955 = vmatprep.subr.mxu0 %v1056_v11 }
  0xb9   : > { %956 = vmatpush3.msra.mxu0 %v365_v18 }
  0xba   : > { %957 = vmatprep.subr.mxu0 %v1056_v11 }
  0xbb   : > { %958 = vmatpush3.msra.mxu0 %v364_v19 }
  0xbc   : > { %959 = vmatprep.subr.mxu0 %v1056_v11 }
  0xbd   : > { %960 = vmatpush3.msra.mxu0 %v363_v20 }
  0xbe   : > { %961 = vmatprep.subr.mxu0 %v1056_v11 }
  0xbf   : > { %962 = vmatpush3.msra.mxu0 %v362_v21 }
  0xc0   : > { %963 = vmatprep.subr.mxu0 %v1056_v11 }
  0xc1   : > { %964 = vmatpush3.msra.mxu0 %v361_v22 }
  0xc2   : > { %965 = vmatprep.subr.mxu0 %v1056_v11 }
  0xc3   : > { %966 = vmatpush3.msra.mxu0 %v360_v23 }
  0xc4   : > { %967 = vmatprep.subr.mxu0 %v1056_v11 }
  0xc5   : > { %968 = vmatpush3.msra.mxu0 %v359_v24 }
  0xc6   : > { %969 = vmatprep.subr.mxu0 %v1056_v11 }
  0xc7   : > { %970 = vmatpush3.msra.mxu0 %v358_v25 }
  0xc8   : > { %971 = vmatprep.subr.mxu0 %v1056_v11 }
  0xc9   : > { %972 = vmatpush3.msra.mxu0 %v357_v26 }
  0xca   : > { %974 = vmatmul.mubr.msk.f32.vlgmr.msra.gmra.mxu0 %vm344_vm2, %v1058_v27 }
 0x18a   : > { %v440_v29 = vpop.f32.mrf.mxu0 }
 0x18b   : > { %v444_v30 = vadd.f32 %v440_v29, %v373_v28 }
 0x18c   : > { %v975_v31 = vpop.f32.mrf.mxu0 }
 0x18d   : > { %446 = vst.msk [vmem:[#allocation2] sm:$0xff] %vm445_vm5, %v444_v30 }
 0x18e PF: > { %p886_p7 = scmp.ne.s32.totalorder %s1118_s30, 1 }
 0x18f   : > { %s1063_s17 = smov (!%p886_p7), 16  }
 0x190   : > { %450 = sbr.rel (%p886_p7) target bundleno = 1367 (0x557), region = 64 }
 0x195   : > { %v490_v32 = vld [vmem:[%s1131_s16 + $0x40] sm:$0xff]  ;;  %v1059_v33 = vmov 0.0   ;;  %v489_v34 = vld [vmem:[%s1131_s16 + $0x38] sm:$0xff]  ;;  %vm1060_vm6 = vmmov 0   ;;  %v1061_v35 = vmov 0   ;;  %v488_v36 = vld [vmem:[%s1131_s16 + $0x30] sm:$0xff] }
 0x196   : > { %976 = vmatprep.subr.mxu0 %v1059_v33  ;;  %994 = vmatprep.mubr.msk.f32.mxu0 %vm1060_vm6, %v1059_v33  ;;  %v589_v37 = vld [vmem:[#allocation3] sm:$0xff]  ;;  %v486_v40 = vld [vmem:[%s1131_s16 + $0x20] sm:$0xff]  ;;  %v485_v41 = vld [vmem:[%s1131_s16 + $0x18] sm:$0xff]  ;;  %v1062_v45 = vmov 1.0   ;;  %vm586_vm7 = vcmask 130048   ;;  %vm603_vm8 = vcmp.lt.s32.totalorder %v1136_v4, 4 }
 0x197   : > { %977 = vmatpush3.msra.mxu0 %v490_v32  ;;  %1037 = vset.pattern.permute.xlu0 %v1061_v35  ;;  %v590_v38 = vmax.f32 %v589_v37, 1.0  ;;  %v487_v39 = vld [vmem:[%s1131_s16 + $0x28] sm:$0xff]  ;;  %v484_v42 = vld [vmem:[%s1131_s16 + $0x10] sm:$0xff]  ;;  %v482_v44 = vld [vmem:[%s1131_s16] sm:$0xff]  ;;  %v888_v58 = vsel %vm603_vm8, 1.0, %v1059_v33  ;;  %vm607_vm9 = vcmask 261120  }
 0x198   : > { %978 = vmatprep.subr.mxu0 %v1059_v33  ;;  %997 = vmatprep.subr.mxu1 %v1059_v33  ;;  %v483_v43 = vld [vmem:[%s1131_s16 + $0x8] sm:$0xff]  ;;  %v514_v47 = vld [vmem:[#allocation2] sm:$0xff]  ;;  %v649_v54 = vld [vmem:[%s1259_s4 + $0x18] sm:$0xff] }
 0x199   : > { %979 = vmatpush3.msra.mxu0 %v489_v34  ;;  %1005 = vmatprep.mubr.msk.f32.mxu1 %vm1060_vm6, %v1059_v33  ;;  %v648_v55 = vld [vmem:[%s1259_s4 + $0x10] sm:$0xff]  ;;  %v647_v56 = vld [vmem:[%s1259_s4 + $0x8] sm:$0xff]  ;;  %v646_v57 = vld [vmem:[%s1259_s4] sm:$0xff] }
 0x19a   : > { %980 = vmatprep.subr.mxu0 %v1059_v33  ;;  %593 = vperm.xlu0 %1037, %v590_v38   ;;  %v889_v19 = vld [vmem:[%s1257_s2] ss:$0 sm:$0xff]  ;;  %v896_v24 = vld [vmem:[%s1259_s4 + $0x38] sm:$0xff]  ;;  %v895_v25 = vld [vmem:[%s1259_s4 + $0x30] sm:$0xff] }
 0x19b   : > { %981 = vmatpush3.msra.mxu0 %v488_v36  ;;  %998 = vmatpush3.msra.mxu1 %v649_v54  ;;  %v890_v21 = vld [vmem:[%s1258_s3] ss:$0 sm:$0xff]  ;;  %v894_v26 = vld [vmem:[%s1259_s4 + $0x28] sm:$0xff]  ;;  %v898_v34 = vld [vmem:[%s1260_s5 + $0x1] ss:$0 sm:$0xff] }
 0x19c   : > { %982 = vmatprep.subr.mxu0 %v1059_v33  ;;  %999 = vmatprep.subr.mxu1 %v1059_v33  ;;  %v893_v27 = vld [vmem:[%s1259_s4 + $0x20] sm:$0xff] }
 0x19d   : > { %983 = vmatpush3.msra.mxu0 %v487_v39  ;;  %1000 = vmatpush3.msra.mxu1 %v648_v55  ;;  %v891_v28 = vld [vmem:[%s1260_s5] ss:$0 sm:$0xff] }
 0x19e   : > { %984 = vmatprep.subr.mxu0 %v1059_v33  ;;  %1001 = vmatprep.subr.mxu1 %v1059_v33 }
 0x19f   : > { %985 = vmatpush3.msra.mxu0 %v486_v40  ;;  %1002 = vmatpush3.msra.mxu1 %v647_v56 }
 0x1a0   : > { %986 = vmatprep.subr.mxu0 %v1059_v33  ;;  %1003 = vmatprep.subr.mxu1 %v1059_v33 }
 0x1a1   : > { %987 = vmatpush3.msra.mxu0 %v485_v41  ;;  %1004 = vmatpush3.msra.mxu1 %v646_v57  ;;  %v901_v41 = vld [vmem:[#allocation4] ss:$0 sm:$0xff] }
 0x1a2   : > { %988 = vmatprep.subr.mxu0 %v1059_v33  ;;  %1008 = vmatprep.subr.mxu1 %v1059_v33 }
 0x1a3   : > { %989 = vmatpush3.msra.mxu0 %v484_v42 }
 0x1a4   : > { %990 = vmatprep.subr.mxu0 %v1059_v33 }
 0x1a5   : > { %991 = vmatpush3.msra.mxu0 %v483_v43 }
 0x1a6   : > { %992 = vmatprep.subr.mxu0 %v1059_v33 }
 0x1a7   : > { %993 = vmatpush3.msra.mxu0 %v482_v44 }
 0x1a8   : > { %995 = vmatmul.mubr.msk.f32.vlgmr.msra.gmra.mxu0 %vm344_vm2, %v1062_v45 }
 0x215   : > { %v594_v46 = vpop.permute.xlu0 %593 }
 0x216   : > { %1038 = vrcp.f32 %v594_v46 }
 0x223   : > { %v1039_v51 = vpop.eup %1038 }
 0x268   : > { %v581_v48 = vpop.f32.mrf.mxu0 }
 0x269   : > { %v585_v49 = vadd.f32 %v581_v48, %v514_v47 }
 0x26a   : > { %v996_v50 = vpop.f32.mrf.mxu0 }
 0x26b   : > { %587 = vst.msk [vmem:[#allocation2] sm:$0xff] %vm586_vm7, %v585_v49 }
 0x272   : > { %v588_v52 = vld [vmem:[#allocation2] sm:$0xff] }
 0x273   : > { %v597_v53 = vmul.f32 %v1039_v51, %v588_v52 }
 0x275   : > { %599 = vrot.lane.b32.xlu0 %v597_v53, %s1063_s17 }
 0x2e7   : > { %v600_v59 = vpop.permute.xlu0 %599 }
 0x2e8   : > { %v602_v60 = vsel %vm586_vm7, %v588_v52, %v600_v59 }
 0x2e9   : > { %v606_v61 = vmul.f32 %v888_v58, %v602_v60 }
 0x2eb   : > { %v608_v62 = vsel %vm607_vm9, %v606_v61, 0.0 }
 0x2ec   : > { %v609_v63 = vrot.slane %v608_v62, 4 }
 0x2ee   : > { %v610_v0 = vadd.f32 %v609_v63, %v608_v62 }
 0x2f0   : > { %v611_v1 = vrot.slane %v610_v0, 2 }
 0x2f2   : > { %v612_v2 = vadd.f32 %v611_v1, %v610_v0 }
 0x2f4   : > { %v613_v3 = vrot.slane %v612_v2, 1 }
 0x2f6   : > { %v614_v5 = vadd.f32 %v613_v3, %v612_v2 }
 0x2f8   : > { %v615_v6 = vmul.f32 0.25, %v614_v5 }
 0x2fa   : > { %v616_v7 = vsub.f32 %v602_v60, %v615_v6 }
 0x2fc   : > { %v617_v8 = vmul.f32 %v888_v58, %v616_v7 }
 0x2fe   : > { %v618_v9 = vmul.f32 %v617_v8, %v617_v8 }
 0x300   : > { %v619_v4 = vsel %vm607_vm9, %v618_v9, 0.0 }
 0x301   : > { %v620_v10 = vrot.slane %v619_v4, 4 }
 0x303   : > { %v621_v11 = vadd.f32 %v620_v10, %v619_v4 }
 0x305   : > { %v622_v12 = vrot.slane %v621_v11, 2 }
 0x307   : > { %v623_v13 = vadd.f32 %v622_v12, %v621_v11 }
 0x309   : > { %v624_v14 = vrot.slane %v623_v13, 1 }
 0x30b   : > { %v625_v15 = vadd.f32 %v624_v14, %v623_v13 }
 0x30d   : > { %v626_v16 = vmul.f32 0.25, %v625_v15 }
 0x30f   : > { %v627_v17 = vadd.f32 1e-05, %v626_v16 }
 0x311   : > { %1040 = vrsqrt.f32 %v627_v17 }
 0x31e   : > { %v1041_v18 = vpop.eup %1040 }
 0x31f   : > { %v629_v20 = vmul.f32 %v1041_v18, %v616_v7 }
 0x321   : > { %v637_v22 = vmul.f32 %v889_v19, %v629_v20 }
 0x323   : > { %v645_v23 = vadd.f32 %v890_v21, %v637_v22 }
 0x325   : > { %1006 = vmatmul.mubr.msk.f32.vlgmr.msra.gmra.mxu1 %vm607_vm9, %v645_v23 }
 0x326   : > { %1016 = vmatprep.mubr.msk.f32.mxu1 %vm1060_vm6, %v1059_v33  ;;  %1009 = vmatpush3.msra.mxu1 %v896_v24 }
 0x327   : > { %1010 = vmatprep.subr.mxu1 %v1059_v33 }
 0x328   : > { %1011 = vmatpush3.msra.mxu1 %v895_v25 }
 0x329   : > { %1012 = vmatprep.subr.mxu1 %v1059_v33 }
 0x32a   : > { %1013 = vmatpush3.msra.mxu1 %v894_v26 }
 0x32b   : > { %1014 = vmatprep.subr.mxu1 %v1059_v33  ;;  %v900_v33 = vld [vmem:[%s1261_s6] ss:$0 sm:$0xff] }
 0x32c   : > { %1015 = vmatpush3.msra.mxu1 %v893_v27 }
 0x3e5   : > { %v726_v29 = vpop.f32.mrf.mxu1 }
 0x3e6   : > { %v727_v30 = vadd.f32 %v891_v28, %v726_v29 }
 0x3e7   : > { %v1007_v31 = vpop.f32.mrf.mxu1 }
 0x3e8   : > { %1042 = vtanh.f32 %v727_v30 }
 0x3f5   : > { %v1043_v32 = vpop.eup %1042 }
 0x3f6   : > { %1017 = vmatmul.mubr.msk.f32.vlgmr.msra.gmra.mxu1 %vm607_vm9, %v1043_v32 }
 0x4b6   : > { %v813_v35 = vpop.f32.mrf.mxu1 }
 0x4b7   : > { %v814_v36 = vadd.f32 %v898_v34, %v813_v35 }
 0x4b8   : > { %v1018_v37 = vpop.f32.mrf.mxu1 }
 0x4b9   : > { %1044 = vtanh.f32 %v814_v36 }
 0x4c6   : > { %v1045_v38 = vpop.eup %1044 }
 0x4c7   : > { %v825_v39 = vmul.f32 %v1045_v38, %v900_v33 }
 0x4c9   : > { %v826_v40 = vsel %vm607_vm9, %v825_v39, 0.0 }
 0x4ca   : > { %827 = vadd.xlane.f32.xlu1 %v826_v40 }
 0x553   : > { %v828_v42 = vpop.xlane.xlu1 %827 }
 0x554   : > { %v836_v43 = vadd.f32 %v901_v41, %v828_v42 }
 0x556   : > { %837 = vst.msk [vmem:[%s1263_s8] sm:$0xff] %vm351_vm3, %v836_v43 }
 0x557 PF: > { %s20_s29 = sadd.s32 1, %s1052_s29  }
 0x558   : > { %p17_p8 = scmp.ge.s32.totalorder %s20_s29, 4  }
 0x55a   :  { %19 = sbr.rel (!%p17_p8) target bundleno = 3 (0x3), region = 95 }

</bundles_post_ra>
